<compile_context>
chip_gen: v6e
topology: v6e:2x2x1
jax: 0.10.0
libtpu: 0.0.40
codegen_flags: <defaults>
</compile_context>

<pallas_src>
import functools

import jax
import jax.numpy as jnp
from jax import lax
from jax.experimental import pallas as pl
from jax.experimental.pallas import tpu as pltpu

BN_EPS = 1e-5
LEAKY_SLOPE = 0.1
LANE = 128


def _round_up(x, m):
    return ((x + m - 1) // m) * m


def _cnnblock_kernel(p_ref, w_ref, gb_ref, o_ref, stats_ref, affine_ref, *, m_true):
    """Grid = (phase, m_tile).  phase 0: conv + stats; phase 1: conv + BN + LeakyReLU."""
    phase = pl.program_id(0)
    i = pl.program_id(1)
    nm = pl.num_programs(1)

    @pl.when((phase == 0) & (i == 0))
    def _init_stats():
        stats_ref[...] = jnp.zeros_like(stats_ref)

    # Conv tile as an im2col matmul on the MXU; accumulate in f32 regardless of
    # operand dtype (bf16 operands allowed on v6e/v7x).
    y = jnp.dot(p_ref[...], w_ref[...], preferred_element_type=jnp.float32)  # (TM, C_pad)

    @pl.when(phase == 0)
    def _accumulate_stats():
        # Single pass: per-channel sum and sum-of-squares, accumulated across
        # all M tiles in a tiny f32 VMEM scratch (2 * C_pad floats).
        stats_ref[0:1, :] = stats_ref[0:1, :] + jnp.sum(y, axis=0, keepdims=True)
        stats_ref[1:2, :] = stats_ref[1:2, :] + jnp.sum(y * y, axis=0, keepdims=True)

    @pl.when((phase == 0) & (i == nm - 1))
    def _finalize_stats():
        inv_m = 1.0 / float(m_true)           # true M (zero-padded rows add 0 to both sums)
        mean = stats_ref[0:1, :] * inv_m
        var = jnp.maximum(stats_ref[1:2, :] * inv_m - mean * mean, 0.0)
        inv_std = lax.rsqrt(var + BN_EPS)
        scale = gb_ref[0:1, :] * inv_std       # gamma * rsqrt(var + eps)
        affine_ref[0:1, :] = scale
        affine_ref[1:2, :] = gb_ref[1:2, :] - mean * scale   # beta - mean * scale

    @pl.when(phase == 1)
    def _normalize_and_activate():
        yh = y * affine_ref[0:1, :] + affine_ref[1:2, :]
        o_ref[...] = jnp.where(yh >= 0.0, yh, LEAKY_SLOPE * yh).astype(o_ref.dtype)


def _im2col_nchw(x, kh, kw, stride, padding):
    """x: (N, Cin, H, W) -> patches (N*Ho*Wo, Cin*kh*kw); K ordered (Cin, kh, kw)."""
    n, cin, h, w = x.shape
    xp = jnp.pad(x, ((0, 0), (0, 0), (padding, padding), (padding, padding)))
    ho = (h + 2 * padding - kh) // stride + 1
    wo = (w + 2 * padding - kw) // stride + 1
    cols = []
    for dh in range(kh):
        for dw in range(kw):
            cols.append(xp[:, :, dh:dh + stride * ho:stride, dw:dw + stride * wo:stride])
    patches = jnp.stack(cols, axis=2)                       # (N, Cin, kh*kw, Ho, Wo)
    patches = patches.reshape(n, cin * kh * kw, ho, wo)     # K = Cin-major, (kh,kw)-minor
    patches = patches.transpose(0, 2, 3, 1).reshape(n * ho * wo, cin * kh * kw)
    return patches, ho, wo


@functools.partial(jax.jit,
                   static_argnames=("stride", "padding", "block_m", "compute_dtype"))
def cnn_block_forward(x_nchw, weight, gamma, beta, *, stride=1, padding=1,
                      block_m=512, compute_dtype=jnp.float32):
    """x_nchw: (N, Cin, H, W); weight: (Cout, Cin, kh, kw). Returns (N, Cout, Ho, Wo)."""
    n, cin, h, w = x_nchw.shape
    cout, _, kh, kw = weight.shape

    patches, ho, wo = _im2col_nchw(x_nchw, kh, kw, stride, padding)   # (M, K)
    m, k = patches.shape

    # Lane / MXU friendly padding of the contraction and channel dimensions.
    k_pad = _round_up(k, LANE)
    c_pad = _round_up(cout, LANE)

    # Tile-size choice: big enough to amortize per-step overhead, small enough
    # that double-buffered patch/output tiles + resident weight stay well under
    # the scoped-VMEM budget on every generation (v7x: 64 MiB physical,
    # 32 MiB default scoped per TensorCore).
    itemsize = jnp.dtype(compute_dtype).itemsize
    vmem_budget = 24 * 1024 * 1024
    fixed_bytes = k_pad * c_pad * itemsize + 4 * 2 * c_pad * 4        # weight + gb + scratch
    row_bytes = 2 * (k_pad * itemsize + c_pad * 4)                    # 2x = double buffering
    tm_cap = max(8, ((vmem_budget - fixed_bytes) // row_bytes) // 8 * 8)
    tm = _round_up(max(8, min(block_m, m, tm_cap)), 8)
    m_pad = _round_up(m, tm)
    num_m = m_pad // tm

    patches_p = jnp.pad(patches, ((0, m_pad - m), (0, k_pad - k))).astype(compute_dtype)
    w_mat = weight.reshape(cout, cin * kh * kw).T                     # (K, Cout)
    w_p = jnp.pad(w_mat, ((0, k_pad - k), (0, c_pad - cout))).astype(compute_dtype)
    gb = jnp.stack(
        [jnp.pad(gamma.astype(jnp.float32), (0, c_pad - cout), constant_values=1.0),
         jnp.pad(beta.astype(jnp.float32), (0, c_pad - cout))], axis=0)  # (2, C_pad) f32

    kernel = functools.partial(_cnnblock_kernel, m_true=m)

    grid = (2, num_m)  # (phase, m-tile); phase 0 = stats pass, phase 1 = normalize pass

    out = pl.pallas_call(
        kernel,
        out_shape=jax.ShapeDtypeStruct((m_pad, c_pad), jnp.float32),
        grid_spec=pltpu.PrefetchScalarGridSpec(
            num_scalar_prefetch=0,
            grid=grid,
            in_specs=[
                # Patch tiles: streamed + double-buffered along the M grid axis.
                pl.BlockSpec((tm, k_pad), lambda p, i: (i, 0)),
                # Weight: constant block index -> stays VMEM-resident across the grid.
                pl.BlockSpec((k_pad, c_pad), lambda p, i: (0, 0)),
                # gamma/beta (row 0/1): resident, read once in the stats finalize step.
                pl.BlockSpec((2, c_pad), lambda p, i: (0, 0)),
            ],
            # During phase 0 the output block index is pinned to 0 so no per-tile
            # writeback happens in the stats pass; phase 1 writes every tile.
            out_specs=pl.BlockSpec((tm, c_pad), lambda p, i: (p * i, 0)),
            scratch_shapes=[
                pltpu.VMEM((2, c_pad), jnp.float32),   # running sum / sum-of-squares
                pltpu.VMEM((2, c_pad), jnp.float32),   # fused scale / shift
            ],
        ),
        compiler_params=pltpu.CompilerParams(
            # Both axes carry cross-iteration state (global BN statistics), so
            # they must run sequentially on one core.
            dimension_semantics=("arbitrary", "arbitrary"),
        ),
    )(patches_p, w_p, gb)

    out = out[:m, :cout].reshape(n, ho, wo, cout)
    # NCHW to match the PyTorch module; NHWC-consuming callers could skip this
    # transpose and save a full HBM round trip of the activation tensor.
    return out.transpose(0, 3, 1, 2)


def _reference(x_nchw, weight, gamma, beta, stride=1, padding=1):
    y = lax.conv_general_dilated(
        x_nchw, weight, window_strides=(stride, stride),
        padding=[(padding, padding), (padding, padding)],
        dimension_numbers=("NCHW", "OIHW", "NCHW"))
    mean = jnp.mean(y, axis=(0, 2, 3), keepdims=True)
    var = jnp.mean((y - mean) ** 2, axis=(0, 2, 3), keepdims=True)
    y_hat = (y - mean) * lax.rsqrt(var + BN_EPS)
    y_hat = y_hat * gamma.reshape(1, -1, 1, 1) + beta.reshape(1, -1, 1, 1)
    return jnp.where(y_hat >= 0, y_hat, LEAKY_SLOPE * y_hat)


if __name__ == "__main__":
    key = jax.random.PRNGKey(0)
    k_x, k_w = jax.random.split(key)

    # Small shapes consistent with CNNBlock(4, 8, kernel_size=3, stride=1, padding=1).
    N, CIN, COUT, H, W, KH, KW = 2, 4, 8, 16, 16, 3, 3

    x = jax.random.normal(k_x, (N, CIN, H, W), dtype=jnp.float32)
    fan_in = CIN * KH * KW
    weight = jax.random.normal(k_w, (COUT, CIN, KH, KW), dtype=jnp.float32) / jnp.sqrt(fan_in)
    gamma = jnp.ones((COUT,), dtype=jnp.float32)   # BatchNorm2d default init
    beta = jnp.zeros((COUT,), dtype=jnp.float32)

    ref = _reference(x, weight, gamma, beta)

    # f32 path; block_m=128 forces multiple M tiles (M=512 -> 4 tiles) so the
    # cross-tile BatchNorm accumulator and the two-phase grid are exercised.
    out = cnn_block_forward(x, weight, gamma, beta, stride=1, padding=1, block_m=128)
    out = jax.block_until_ready(out)
    assert out.shape == (N, COUT, H, W), out.shape
    err = float(jnp.max(jnp.abs(out - ref)))
    assert jnp.allclose(out, ref, atol=1e-4, rtol=1e-4), err

    # bf16 MXU-operand path (v6e/v7x): f32 accumulation + f32 epilogue, looser tolerance.
    out_bf16 = cnn_block_forward(x, weight, gamma, beta, stride=1, padding=1,
                                 block_m=128, compute_dtype=jnp.bfloat16)
    out_bf16 = jax.block_until_ready(out_bf16)
    err_bf16 = float(jnp.max(jnp.abs(out_bf16 - ref)))
    assert jnp.allclose(out_bf16, ref, atol=5e-2, rtol=5e-2), err_bf16

    print("KERNEL_OK")
</pallas_src>

<mosaic_0001>
module attributes {stable_mosaic.version = 11 : i64} {
  func.func @_cnnblock_kernel(%arg0: i32, %arg1: i32, %arg2: memref<128x128xf32, #tpu.memory_space<vmem>>, %arg3: memref<128x128xf32, #tpu.memory_space<vmem>>, %arg4: memref<2x128xf32, #tpu.memory_space<vmem>>, %arg5: memref<128x128xf32, #tpu.memory_space<vmem>>, %arg6: memref<2x128xf32, #tpu.memory_space<vmem>>, %arg7: memref<2x128xf32, #tpu.memory_space<vmem>>) attributes {dimension_semantics = [#tpu.dimension_semantics<arbitrary>, #tpu.dimension_semantics<arbitrary>], iteration_bounds = array<i64: 2, 4>, scalar_prefetch = 0 : i64, scratch_operands = 2 : i64, tpu.core_type = #tpu.core_type<tc>, window_params = [{transform_indices = @transform_0, window_bounds = array<i64: 128, 128>}, {pipeline_mode = #tpu.pipeline_mode<synchronous>, transform_indices = @transform_1, window_bounds = array<i64: 128, 128>}, {pipeline_mode = #tpu.pipeline_mode<synchronous>, transform_indices = @transform_2, window_bounds = array<i64: 2, 128>}, {transform_indices = @transform_3, window_bounds = array<i64: 128, 128>}]} {
    %c0_i32 = arith.constant 0 : i32
    %0 = arith.cmpi eq, %arg0, %c0_i32 : i32
    %c0_i32_0 = arith.constant 0 : i32
    %1 = arith.cmpi eq, %arg1, %c0_i32_0 : i32
    %2 = arith.andi %0, %1 : i1
    %3 = arith.extui %2 : i1 to i32
    %c0_i32_1 = arith.constant 0 : i32
    %4 = arith.cmpi ne, %3, %c0_i32_1 : i32
    scf.if %4 {
      %cst_10 = arith.constant 0.000000e+00 : f32
      %19 = vector.broadcast %cst_10 : f32 to vector<2x128xf32>
      %c0_11 = arith.constant 0 : index
      %c0_12 = arith.constant 0 : index
      %20 = vector.load %arg6[%c0_11, %c0_12] : memref<2x128xf32, #tpu.memory_space<vmem>>, vector<2x128xf32>
      tpu.vector_store %arg6[%c0_11, %c0_12], %19 {strides = array<i32>} : memref<2x128xf32, #tpu.memory_space<vmem>>, vector<2x128xf32>,
    } else {
    }
    %c0 = arith.constant 0 : index
    %c0_2 = arith.constant 0 : index
    %5 = vector.load %arg2[%c0, %c0_2] : memref<128x128xf32, #tpu.memory_space<vmem>>, vector<128x128xf32>
    %c0_3 = arith.constant 0 : index
    %c0_4 = arith.constant 0 : index
    %6 = vector.load %arg3[%c0_3, %c0_4] : memref<128x128xf32, #tpu.memory_space<vmem>>, vector<128x128xf32>
    %cst = arith.constant dense<0.000000e+00> : vector<128x128xf32>
    %7 = tpu.matmul %5, %6, %cst {dimension_numbers = #tpu.dot_dimension_numbers<[1], [0], [0], [1], [0, 0, 1, 1], [], []>} : vector<128x128xf32>, vector<128x128xf32>, vector<128x128xf32> -> vector<128x128xf32>
    %c0_i32_5 = arith.constant 0 : i32
    %8 = arith.cmpi eq, %arg0, %c0_i32_5 : i32
    %9 = arith.extui %8 : i1 to i32
    %c0_i32_6 = arith.constant 0 : i32
    %10 = arith.cmpi ne, %9, %c0_i32_6 : i32
    scf.if %10 {
      %c0_10 = arith.constant 0 : index
      %c0_11 = arith.constant 0 : index
      %19 = vector.load %arg6[%c0_10, %c0_11] : memref<2x128xf32, #tpu.memory_space<vmem>>, vector<1x128xf32>
      %cst_12 = arith.constant dense<0.000000e+00> : vector<128xf32>
      %20 = vector.multi_reduction <add>, %7, %cst_12 [0] : vector<128x128xf32> to vector<128xf32>
      %21 = vector.shape_cast %20 : vector<128xf32> to vector<1x128xf32>
      %22 = arith.addf %19, %21 : vector<1x128xf32>
      %c0_13 = arith.constant 0 : index
      %c0_14 = arith.constant 0 : index
      %23 = vector.load %arg6[%c0_13, %c0_14] : memref<2x128xf32, #tpu.memory_space<vmem>>, vector<1x128xf32>
      tpu.vector_store %arg6[%c0_13, %c0_14], %22 {strides = array<i32>} : memref<2x128xf32, #tpu.memory_space<vmem>>, vector<1x128xf32>,
      %c1 = arith.constant 1 : index
      %c0_15 = arith.constant 0 : index
      %24 = vector.load %arg6[%c1, %c0_15] : memref<2x128xf32, #tpu.memory_space<vmem>>, vector<1x128xf32>
      %25 = arith.mulf %7, %7 : vector<128x128xf32>
      %cst_16 = arith.constant dense<0.000000e+00> : vector<128xf32>
      %26 = vector.multi_reduction <add>, %25, %cst_16 [0] : vector<128x128xf32> to vector<128xf32>
      %27 = vector.shape_cast %26 : vector<128xf32> to vector<1x128xf32>
      %28 = arith.addf %24, %27 : vector<1x128xf32>
      %c1_17 = arith.constant 1 : index
      %c0_18 = arith.constant 0 : index
      %29 = vector.load %arg6[%c1_17, %c0_18] : memref<2x128xf32, #tpu.memory_space<vmem>>, vector<1x128xf32>
      tpu.vector_store %arg6[%c1_17, %c0_18], %28 {strides = array<i32>} : memref<2x128xf32, #tpu.memory_space<vmem>>, vector<1x128xf32>,
    } else {
    }
    %c0_i32_7 = arith.constant 0 : i32
    %11 = arith.cmpi eq, %arg0, %c0_i32_7 : i32
    %c3_i32 = arith.constant 3 : i32
    %12 = arith.cmpi eq, %arg1, %c3_i32 : i32
    %13 = arith.andi %11, %12 : i1
    %14 = arith.extui %13 : i1 to i32
    %c0_i32_8 = arith.constant 0 : i32
    %15 = arith.cmpi ne, %14, %c0_i32_8 : i32
    scf.if %15 {
      %c0_10 = arith.constant 0 : index
      %c0_11 = arith.constant 0 : index
      %19 = vector.load %arg6[%c0_10, %c0_11] : memref<2x128xf32, #tpu.memory_space<vmem>>, vector<1x128xf32>
      %cst_12 = arith.constant 0.001953125 : f32
      %20 = vector.broadcast %cst_12 : f32 to vector<1x128xf32>
      %21 = arith.mulf %19, %20 : vector<1x128xf32>
      %c1 = arith.constant 1 : index
      %c0_13 = arith.constant 0 : index
      %22 = vector.load %arg6[%c1, %c0_13] : memref<2x128xf32, #tpu.memory_space<vmem>>, vector<1x128xf32>
      %cst_14 = arith.constant 0.001953125 : f32
      %23 = vector.broadcast %cst_14 : f32 to vector<1x128xf32>
      %24 = arith.mulf %22, %23 : vector<1x128xf32>
      %25 = arith.mulf %21, %21 : vector<1x128xf32>
      %26 = arith.subf %24, %25 : vector<1x128xf32>
      %cst_15 = arith.constant 0.000000e+00 : f32
      %27 = vector.broadcast %cst_15 : f32 to vector<1x128xf32>
      %28 = arith.maximumf %26, %27 : vector<1x128xf32>
      %cst_16 = arith.constant 9.99999974E-6 : f32
      %29 = vector.broadcast %cst_16 : f32 to vector<1x128xf32>
      %30 = arith.addf %28, %29 : vector<1x128xf32>
      %31 = math.rsqrt %30 : vector<1x128xf32>
      %c0_17 = arith.constant 0 : index
      %c0_18 = arith.constant 0 : index
      %32 = vector.load %arg4[%c0_17, %c0_18] : memref<2x128xf32, #tpu.memory_space<vmem>>, vector<1x128xf32>
      %33 = arith.mulf %32, %31 : vector<1x128xf32>
      %c0_19 = arith.constant 0 : index
      %c0_20 = arith.constant 0 : index
      %34 = vector.load %arg7[%c0_19, %c0_20] : memref<2x128xf32, #tpu.memory_space<vmem>>, vector<1x128xf32>
      tpu.vector_store %arg7[%c0_19, %c0_20], %33 {strides = array<i32>} : memref<2x128xf32, #tpu.memory_space<vmem>>, vector<1x128xf32>,
      %c1_21 = arith.constant 1 : index
      %c0_22 = arith.constant 0 : index
      %35 = vector.load %arg4[%c1_21, %c0_22] : memref<2x128xf32, #tpu.memory_space<vmem>>, vector<1x128xf32>
      %36 = arith.mulf %21, %33 : vector<1x128xf32>
      %37 = arith.subf %35, %36 : vector<1x128xf32>
      %c1_23 = arith.constant 1 : index
      %c0_24 = arith.constant 0 : index
      %38 = vector.load %arg7[%c1_23, %c0_24] : memref<2x128xf32, #tpu.memory_space<vmem>>, vector<1x128xf32>
      tpu.vector_store %arg7[%c1_23, %c0_24], %37 {strides = array<i32>} : memref<2x128xf32, #tpu.memory_space<vmem>>, vector<1x128xf32>,
    } else {
    }
    %c1_i32 = arith.constant 1 : i32
    %16 = arith.cmpi eq, %arg0, %c1_i32 : i32
    %17 = arith.extui %16 : i1 to i32
    %c0_i32_9 = arith.constant 0 : i32
    %18 = arith.cmpi ne, %17, %c0_i32_9 : i32
    scf.if %18 {
      %c0_10 = arith.constant 0 : index
      %c0_11 = arith.constant 0 : index
      %19 = vector.load %arg7[%c0_10, %c0_11] : memref<2x128xf32, #tpu.memory_space<vmem>>, vector<1x128xf32>
      %20 = vector.broadcast %19 : vector<1x128xf32> to vector<128x128xf32>
      %21 = arith.mulf %7, %20 : vector<128x128xf32>
      %c1 = arith.constant 1 : index
      %c0_12 = arith.constant 0 : index
      %22 = vector.load %arg7[%c1, %c0_12] : memref<2x128xf32, #tpu.memory_space<vmem>>, vector<1x128xf32>
      %23 = vector.broadcast %22 : vector<1x128xf32> to vector<128x128xf32>
      %24 = arith.addf %21, %23 : vector<128x128xf32>
      %cst_13 = arith.constant 0.000000e+00 : f32
      %25 = vector.broadcast %cst_13 : f32 to vector<128x128xf32>
      %26 = arith.cmpf oge, %24, %25 : vector<128x128xf32>
      %cst_14 = arith.constant 1.000000e-01 : f32
      %27 = vector.broadcast %cst_14 : f32 to vector<128x128xf32>
      %28 = arith.mulf %27, %24 : vector<128x128xf32>
      %29 = arith.select %26, %24, %28 : vector<128x128xi1>, vector<128x128xf32>
      %c0_15 = arith.constant 0 : index
      %c0_16 = arith.constant 0 : index
      %30 = vector.load %arg5[%c0_15, %c0_16] : memref<128x128xf32, #tpu.memory_space<vmem>>, vector<128x128xf32>
      tpu.vector_store %arg5[%c0_15, %c0_16], %29 {strides = array<i32>} : memref<128x128xf32, #tpu.memory_space<vmem>>, vector<128x128xf32>,
    } else {
    }
    return
  }
  func.func @transform_0(%arg0: i32, %arg1: i32) -> (i32, i32) {
    %c0_i32 = arith.constant 0 : i32
    %c0_i32_0 = arith.constant 0 : i32
    return %arg1, %c0_i32 : i32, i32
  }
  func.func @transform_1(%arg0: i32, %arg1: i32) -> (i32, i32) {
    %c0_i32 = arith.constant 0 : i32
    %c0_i32_0 = arith.constant 0 : i32
    %c0_i32_1 = arith.constant 0 : i32
    return %c0_i32, %c0_i32_0 : i32, i32
  }
  func.func @transform_2(%arg0: i32, %arg1: i32) -> (i32, i32) {
    %c0_i32 = arith.constant 0 : i32
    %c0_i32_0 = arith.constant 0 : i32
    %c0_i32_1 = arith.constant 0 : i32
    return %c0_i32, %c0_i32_0 : i32, i32
  }
  func.func @transform_3(%arg0: i32, %arg1: i32) -> (i32, i32) {
    %0 = arith.muli %arg0, %arg1 : i32
    %c0_i32 = arith.constant 0 : i32
    %c0_i32_0 = arith.constant 0 : i32
    return %0, %c0_i32 : i32, i32
  }
}

</mosaic_0001>

<bundles_post_ra>
// kernel: cnn_block_forward.1
= control target key start
LH: loop header
LB: loop body
LE: loop exit
PB: predicated region body
PF: predicated region fallthrough
CT: control target
= control target key end

     0   :  { %s883_s12 = smov 0   ;;  %s885_s13 = smov 0   ;;  %s1172_s0 = inlined_call_operand.vmem [shape: f32[512,128], index: 0, kind: input, shape index: {}]   ;;  %s1173_s1 = inlined_call_operand.vmem [shape: f32[128,128], index: 1, kind: input, shape index: {}]   ;;  %s1174_s2 = inlined_call_operand.vmem [shape: f32[2,128], index: 2, kind: input, shape index: {}]   ;;  %s1175_s3 = inlined_call_operand.vmem [shape: f32[512,128], index: 3, kind: output, shape index: {}]  }
   0x1   :  { %s887_s14 = smov 0   ;;  %s889_s15 = smov 0  }
   0x2   :  { %s891_s16 = smov 0  }
   0x3 LB: > { %s22_s17 = sadd.s32 1, %s852_s14  ;;  %s25_s18 = sadd.s32 1, %s856_s15  ;;  %s860_s16 = sphi %s891_s16, %s13_s16   ;;  %s856_s15 = sphi %s889_s15, %s1179_s15   ;;  %s852_s14 = sphi %s887_s14, %s1178_s14   ;;  %s848_s13 = sphi %s885_s13, %s1177_s13   ;;  %s844_s12 = sphi %s883_s12, %s1176_s12  }
   0x4   : > { %p23_p0 = scmp.ge.s32.totalorder %s22_s17, 4  ;;  %p648_p1 = scmp.ge.s32.totalorder %s860_s16, 1 }
   0x5   : > { %p152_p2 = scmp.lt.s32.totalorder %s860_s16, 9 }
   0x6   : > { %s1181_s17 = smov (%p23_p0, %s22_s17), 0  ;;  %s1183_s18 = smov (!%p23_p0, %s25_s18), %s856_s15 }
   0x7   : > { %p153_p3 = pnand %p648_p1, %p152_p2  ;;  %p27_p4 = scmp.ge.s32.totalorder %s1183_s18, 2 }
   0x8   : > { %s649_s19 = sshll.u32 (!%p153_p3), %s844_s12, 4  ;;  %s183_s20 = smul.u32 (!%p153_p3), %s844_s12, %s848_s13 }
   0x9   : > { %s1185_s18 = smov (%p27_p4, %s1183_s18), 0  ;;  %156 = sbr.rel (%p153_p3) target bundleno = 386 (0x182), region = 32 }
   0xa   : > { %p178_p5 = scmp.lt.s32.totalorder (!%p153_p3), %s649_s19, 63  ;;  %p191_p6 = scmp.eq.s32.totalorder (!%p153_p3), %s848_s13, 0 }
   0xb   : > { %s651_s21 = sshll.u32 (!%p153_p3), %s183_s20, 4  ;;  %p192_p7 = scmp.eq.s32.totalorder (!%p153_p3), %s844_s12, 0 }
   0xc   : > { %p185_p8 = scmp.lt.s32.totalorder (!%p153_p3), %s651_s21, 63 }
   0xd   : > { %p193_p9 = pnand (!%p153_p3), %p192_p7, %p191_p6 }
   0xe   : > { %s1187_s19 = smov (!%p178_p5, %s649_s19), 63  ;;  %s1189_s21 = smov (!%p185_p8, %s651_s21), 63 }
   0xf   : > { %s650_s22 = sshll.u32 %s1187_s19, 3  ;;  %s652_s26 = sshll.u32 %s1189_s21, 3 }
  0x10   : > { %s927_s25 = scalar_lea.vmem %s1172_s0, %s650_s22  ;;  %s932_s29 = scalar_lea.vmem %s1175_s3, %s652_s26 }
  0x11   : > { %196 = sbr.rel (%p193_p9) target bundleno = 24 (0x18), region = 36 }
  0x16   : > { %v862_v0 = vmov 0.0  }
  0x17   : > { %197 = vst [vmem:[#allocation2] sm:$0x3] %v862_v0 }
  0x18 PF: > { %v229_v1 = vld [vmem:[%s1173_s1 + $0x78] sm:$0xff]  ;;  %v228_v2 = vld [vmem:[%s1173_s1 + $0x70] sm:$0xff]  ;;  %v227_v3 = vld [vmem:[%s1173_s1 + $0x68] sm:$0xff]  ;;  %p653_p10 = scmp.ne.s32.totalorder %s848_s13, 0 }
  0x19   : > { %691 = vmatprep.subr.mxu0 %v229_v1  ;;  %747 = vmatprep.subr.mxu1 %v229_v1  ;;  %v226_v4 = vld [vmem:[%s1173_s1 + $0x60] sm:$0xff]  ;;  %v225_v5 = vld [vmem:[%s1173_s1 + $0x58] sm:$0xff]  ;;  %v224_v6 = vld [vmem:[%s1173_s1 + $0x50] sm:$0xff] }
  0x1a   : > { %692 = vmatpush3.msra.mxu0 %v229_v1  ;;  %763 = vmatpush3.msra.mxu1 %v229_v1  ;;  %v223_v7 = vld [vmem:[%s1173_s1 + $0x48] sm:$0xff]  ;;  %v222_v8 = vld [vmem:[%s1173_s1 + $0x40] sm:$0xff]  ;;  %v221_v9 = vld [vmem:[%s1173_s1 + $0x38] sm:$0xff] }
  0x1b   : > { %693 = vmatprep.subr.mxu0 %v228_v2  ;;  %748 = vmatprep.subr.mxu1 %v228_v2  ;;  %v220_v10 = vld [vmem:[%s1173_s1 + $0x30] sm:$0xff]  ;;  %v219_v11 = vld [vmem:[%s1173_s1 + $0x28] sm:$0xff]  ;;  %v218_v12 = vld [vmem:[%s1173_s1 + $0x20] sm:$0xff] }
  0x1c   : > { %694 = vmatpush3.msra.mxu0 %v228_v2  ;;  %764 = vmatpush3.msra.mxu1 %v228_v2  ;;  %v217_v13 = vld [vmem:[%s1173_s1 + $0x18] sm:$0xff]  ;;  %v216_v14 = vld [vmem:[%s1173_s1 + $0x10] sm:$0xff]  ;;  %v215_v15 = vld [vmem:[%s1173_s1 + $0x8] sm:$0xff] }
  0x1d   : > { %695 = vmatprep.subr.mxu0 %v227_v3  ;;  %749 = vmatprep.subr.mxu1 %v227_v3  ;;  %v214_v16 = vld [vmem:[%s1173_s1] sm:$0xff]  ;;  %v199_v19 = vld [vmem:[%s927_s25 + $0x8] sm:$0xff]  ;;  %v200_v21 = vld [vmem:[%s927_s25 + $0x10] sm:$0xff] }
  0x1e   : > { %696 = vmatpush3.msra.mxu0 %v227_v3  ;;  %765 = vmatpush3.msra.mxu1 %v227_v3  ;;  %v198_v17 = vld [vmem:[%s927_s25] sm:$0xff]  ;;  %v207_v20 = vld [vmem:[%s927_s25 + $0x48] sm:$0xff]  ;;  %v208_v22 = vld [vmem:[%s927_s25 + $0x50] sm:$0xff] }
  0x1f   : > { %697 = vmatprep.subr.mxu0 %v226_v4  ;;  %750 = vmatprep.subr.mxu1 %v226_v4  ;;  %v206_v18 = vld [vmem:[%s927_s25 + $0x40] sm:$0xff]  ;;  %v201_v23 = vld [vmem:[%s927_s25 + $0x18] sm:$0xff]  ;;  %v203_v27 = vld [vmem:[%s927_s25 + $0x28] sm:$0xff] }
  0x20   : > { %698 = vmatpush3.msra.mxu0 %v226_v4  ;;  %766 = vmatpush3.msra.mxu1 %v226_v4  ;;  %v209_v24 = vld [vmem:[%s927_s25 + $0x58] sm:$0xff]  ;;  %v202_v25 = vld [vmem:[%s927_s25 + $0x20] sm:$0xff]  ;;  %v211_v28 = vld [vmem:[%s927_s25 + $0x68] sm:$0xff] }
  0x21   : > { %699 = vmatprep.subr.mxu0 %v225_v5  ;;  %751 = vmatprep.subr.mxu1 %v225_v5  ;;  %v210_v26 = vld [vmem:[%s927_s25 + $0x60] sm:$0xff]  ;;  %v204_v29 = vld [vmem:[%s927_s25 + $0x30] sm:$0xff]  ;;  %v205_v31 = vld [vmem:[%s927_s25 + $0x38] sm:$0xff] }
  0x22   : > { %700 = vmatpush3.msra.mxu0 %v225_v5  ;;  %767 = vmatpush3.msra.mxu1 %v225_v5  ;;  %v212_v30 = vld [vmem:[%s927_s25 + $0x70] sm:$0xff]  ;;  %v213_v32 = vld [vmem:[%s927_s25 + $0x78] sm:$0xff] }
  0x23   : > { %701 = vmatprep.subr.mxu0 %v224_v6  ;;  %752 = vmatprep.subr.mxu1 %v224_v6 }
  0x24   : > { %702 = vmatpush3.msra.mxu0 %v224_v6  ;;  %768 = vmatpush3.msra.mxu1 %v224_v6 }
  0x25   : > { %703 = vmatprep.subr.mxu0 %v223_v7  ;;  %753 = vmatprep.subr.mxu1 %v223_v7 }
  0x26   : > { %704 = vmatpush3.msra.mxu0 %v223_v7  ;;  %769 = vmatpush3.msra.mxu1 %v223_v7 }
  0x27   : > { %705 = vmatprep.subr.mxu0 %v222_v8  ;;  %754 = vmatprep.subr.mxu1 %v222_v8 }
  0x28   : > { %706 = vmatpush3.msra.mxu0 %v222_v8  ;;  %770 = vmatpush3.msra.mxu1 %v222_v8 }
  0x29   : > { %707 = vmatprep.subr.mxu0 %v221_v9  ;;  %755 = vmatprep.subr.mxu1 %v221_v9 }
  0x2a   : > { %708 = vmatpush3.msra.mxu0 %v221_v9  ;;  %771 = vmatpush3.msra.mxu1 %v221_v9 }
  0x2b   : > { %709 = vmatprep.subr.mxu0 %v220_v10  ;;  %756 = vmatprep.subr.mxu1 %v220_v10 }
  0x2c   : > { %710 = vmatpush3.msra.mxu0 %v220_v10  ;;  %772 = vmatpush3.msra.mxu1 %v220_v10 }
  0x2d   : > { %711 = vmatprep.subr.mxu0 %v219_v11  ;;  %757 = vmatprep.subr.mxu1 %v219_v11 }
  0x2e   : > { %712 = vmatpush3.msra.mxu0 %v219_v11  ;;  %773 = vmatpush3.msra.mxu1 %v219_v11 }
  0x2f   : > { %713 = vmatprep.subr.mxu0 %v218_v12  ;;  %758 = vmatprep.subr.mxu1 %v218_v12 }
  0x30   : > { %714 = vmatpush3.msra.mxu0 %v218_v12  ;;  %774 = vmatpush3.msra.mxu1 %v218_v12 }
  0x31   : > { %715 = vmatprep.subr.mxu0 %v217_v13  ;;  %759 = vmatprep.subr.mxu1 %v217_v13 }
  0x32   : > { %716 = vmatpush3.msra.mxu0 %v217_v13  ;;  %775 = vmatpush3.msra.mxu1 %v217_v13 }
  0x33   : > { %717 = vmatprep.subr.mxu0 %v216_v14  ;;  %760 = vmatprep.subr.mxu1 %v216_v14 }
  0x34   : > { %718 = vmatpush3.msra.mxu0 %v216_v14  ;;  %776 = vmatpush3.msra.mxu1 %v216_v14 }
  0x35   : > { %719 = vmatprep.subr.mxu0 %v215_v15  ;;  %761 = vmatprep.subr.mxu1 %v215_v15 }
  0x36   : > { %720 = vmatpush3.msra.mxu0 %v215_v15  ;;  %777 = vmatpush3.msra.mxu1 %v215_v15 }
  0x37   : > { %721 = vmatprep.subr.mxu0 %v214_v16  ;;  %762 = vmatprep.subr.mxu1 %v214_v16 }
  0x38   : > { %722 = vmatpush3.msra.mxu0 %v214_v16  ;;  %778 = vmatpush3.msra.mxu1 %v214_v16 }
  0x39   : > { %723 = vmatprep.mubr.f32.mxu0 %v198_v17  ;;  %735 = vmatprep.mubr.f32.mxu1 %v206_v18 }
  0x3a   : > { %724 = vmatmul.mubr.f32.vlgmr.msra.gmra.mxu0 %v199_v19  ;;  %736 = vmatmul.mubr.f32.vlgmr.msra.gmra.mxu1 %v207_v20 }
  0x3b   : > { %726 = vmatprep.mubr.f32.mxu0 %v200_v21  ;;  %738 = vmatprep.mubr.f32.mxu1 %v208_v22 }
  0x3e   : > { %727 = vmatmul.mubr.f32.gmra.mxu0 %v201_v23  ;;  %739 = vmatmul.mubr.f32.gmra.mxu1 %v209_v24 }
  0x3f   : > { %729 = vmatprep.mubr.f32.mxu0 %v202_v25  ;;  %741 = vmatprep.mubr.f32.mxu1 %v210_v26 }
  0x42   : > { %730 = vmatmul.mubr.f32.gmra.mxu0 %v203_v27  ;;  %742 = vmatmul.mubr.f32.gmra.mxu1 %v211_v28 }
  0x43   : > { %732 = vmatprep.mubr.f32.mxu0 %v204_v29  ;;  %744 = vmatprep.mubr.f32.mxu1 %v212_v30 }
  0x46   : > { %733 = vmatmul.mubr.f32.gmra.mxu0 %v205_v31  ;;  %745 = vmatmul.mubr.f32.gmra.mxu1 %v213_v32 }
  0xfa   : > { %v998_v33 = vpop.f32.mrf.mxu0  ;;  %v1000_v34 = vpop.f32.mrf.mxu1 }
  0xfc   : > { %v1002_v35 = vpop.f32.mrf.mxu0  ;;  %v1004_v36 = vpop.f32.mrf.mxu1 }
  0xfe   : > { %v1006_v37 = vpop.f32.mrf.mxu0  ;;  %v1008_v38 = vpop.f32.mrf.mxu1 }
 0x100   : > { %v1010_v39 = vpop.f32.mrf.mxu0  ;;  %v1012_v40 = vpop.f32.mrf.mxu1 }
 0x102   : > { %v1014_v41 = vpop.f32.mrf.mxu0  ;;  %v1016_v42 = vpop.f32.mrf.mxu1 }
 0x104   : > { %v1018_v43 = vpop.f32.mrf.mxu0  ;;  %v1020_v44 = vpop.f32.mrf.mxu1  ;;  %377 = sbr.rel (%p653_p10) target bundleno = 312 (0x138), region = 40 }
 0x106   : > { %v1022_v45 = vpop.f32.mrf.mxu0  ;;  %v1024_v46 = vpop.f32.mrf.mxu1 }
 0x108   : > { %v1026_v47 = vpop.f32.mrf.mxu0  ;;  %v1028_v48 = vpop.f32.mrf.mxu1 }
 0x109   : > { %v379_v49 = vadd.f32 %v998_v33, %v1002_v35  ;;  %v403_v50 = vmul.f32 %v1002_v35, %v1002_v35  ;;  %v404_v51 = vmul.f32 %v998_v33, %v998_v33  ;;  %v405_v53 = vmul.f32 %v1010_v39, %v1010_v39 }
 0x10a   : > { %v406_v55 = vmul.f32 %v1006_v37, %v1006_v37  ;;  %v407_v58 = vmul.f32 %v1018_v43, %v1018_v43  ;;  %v408_v61 = vmul.f32 %v1014_v41, %v1014_v41  ;;  %v409_v0 = vmul.f32 %v1026_v47, %v1026_v47 }
 0x10b   : > { %v380_v52 = vadd.f32 %v379_v49, %v1010_v39  ;;  %v419_v56 = vadd.f32 %v404_v51, %v403_v50  ;;  %v410_v3 = vmul.f32 %v1022_v45, %v1022_v45  ;;  %v411_v6 = vmul.f32 %v1004_v36, %v1004_v36 }
 0x10c   : > { %v412_v9 = vmul.f32 %v1000_v34, %v1000_v34  ;;  %v413_v12 = vmul.f32 %v1012_v40, %v1012_v40  ;;  %v414_v15 = vmul.f32 %v1008_v38, %v1008_v38  ;;  %v415_v18 = vmul.f32 %v1020_v44, %v1020_v44 }
 0x10d   : > { %v381_v54 = vadd.f32 %v1006_v37, %v380_v52  ;;  %v420_v59 = vadd.f32 %v419_v56, %v405_v53  ;;  %v416_v21 = vmul.f32 %v1016_v42, %v1016_v42  ;;  %v417_v24 = vmul.f32 %v1028_v48, %v1028_v48 }
 0x10e   : > { %v418_v27 = vmul.f32 %v1024_v46, %v1024_v46 }
 0x10f   : > { %v382_v57 = vadd.f32 %v381_v54, %v1018_v43  ;;  %v421_v62 = vadd.f32 %v420_v59, %v406_v55  ;;  %v378_v55 = vld [vmem:[#allocation2] sm:$0x1] }
 0x111   : > { %v383_v60 = vadd.f32 %v1014_v41, %v382_v57  ;;  %v422_v1 = vadd.f32 %v421_v62, %v407_v58 }
 0x113   : > { %v384_v63 = vadd.f32 %v383_v60, %v1026_v47  ;;  %v423_v4 = vadd.f32 %v422_v1, %v408_v61  ;;  %v402_v60 = vld [vmem:[#allocation2 + $0x1] sm:$0x1] }
 0x115   : > { %v385_v2 = vadd.f32 %v1022_v45, %v384_v63  ;;  %v424_v7 = vadd.f32 %v423_v4, %v409_v0 }
 0x117   : > { %v386_v5 = vadd.f32 %v385_v2, %v1004_v36  ;;  %v425_v10 = vadd.f32 %v424_v7, %v410_v3 }
 0x119   : > { %v387_v8 = vadd.f32 %v1000_v34, %v386_v5  ;;  %v426_v13 = vadd.f32 %v425_v10, %v411_v6 }
 0x11b   : > { %v388_v11 = vadd.f32 %v387_v8, %v1012_v40  ;;  %v427_v16 = vadd.f32 %v426_v13, %v412_v9 }
 0x11d   : > { %v389_v14 = vadd.f32 %v1008_v38, %v388_v11  ;;  %v428_v19 = vadd.f32 %v427_v16, %v413_v12 }
 0x11f   : > { %v390_v17 = vadd.f32 %v389_v14, %v1020_v44  ;;  %v429_v22 = vadd.f32 %v428_v19, %v414_v15 }
 0x121   : > { %v391_v20 = vadd.f32 %v1016_v42, %v390_v17  ;;  %v430_v25 = vadd.f32 %v429_v22, %v415_v18 }
 0x123   : > { %v392_v23 = vadd.f32 %v391_v20, %v1028_v48  ;;  %v431_v28 = vadd.f32 %v430_v25, %v416_v21 }
 0x125   : > { %v393_v26 = vadd.f32 %v1024_v46, %v392_v23  ;;  %v432_v30 = vadd.f32 %v431_v28, %v417_v24 }
 0x127   : > { %v394_v29 = vrot.slane %v393_v26, 4  ;;  %v433_v32 = vadd.f32 %v432_v30, %v418_v27 }
 0x129   : > { %v395_v31 = vadd.f32 %v394_v29, %v393_v26  ;;  %v434_v50 = vrot.slane %v433_v32, 4 }
 0x12b   : > { %v396_v49 = vrot.slane %v395_v31, 2  ;;  %v435_v52 = vadd.f32 %v434_v50, %v433_v32 }
 0x12d   : > { %v397_v51 = vadd.f32 %v396_v49, %v395_v31  ;;  %v436_v54 = vrot.slane %v435_v52, 2 }
 0x12f   : > { %v398_v53 = vrot.slane %v397_v51, 1  ;;  %v437_v57 = vadd.f32 %v436_v54, %v435_v52 }
 0x131   : > { %v399_v56 = vadd.f32 %v398_v53, %v397_v51  ;;  %v438_v59 = vrot.slane %v437_v57, 1 }
 0x133   : > { %v400_v58 = vadd.f32 %v399_v56, %v378_v55  ;;  %v439_v61 = vadd.f32 %v438_v59, %v437_v57 }
 0x135   : > { %401 = vst [vmem:[#allocation2] sm:$0x1] %v400_v58  ;;  %v440_v62 = vadd.f32 %v439_v61, %v402_v60 }
 0x137   : > { %441 = vst [vmem:[#allocation2 + $0x1] sm:$0x1] %v440_v62 }
 0x138 PF: > { %p442_p11 = scmp.eq.s32.totalorder %s844_s12, 3 }
 0x13a   : > { %p443_p12 = pnand %p442_p11, %p191_p6 }
 0x13c   : > { %446 = sbr.rel (%p443_p12) target bundleno = 353 (0x161), region = 44 }
 0x141   : > { %v447_v63 = vld [vmem:[#allocation2] sm:$0x1]  ;;  %v449_v0 = vld [vmem:[#allocation2 + $0x1] sm:$0x1] }
 0x142   : > { %v448_v1 = vmul.f32 0.001953125, %v447_v63  ;;  %v450_v2 = vmul.f32 0.001953125, %v449_v0  ;;  %v456_v7 = vld [vmem:[%s1174_s2] sm:$0x1]  ;;  %v459_v10 = vld [vmem:[%s1174_s2 + $0x1] sm:$0x1] }
 0x144   : > { %v451_v3 = vmul.f32 %v448_v1, %v448_v1 }
 0x146   : > { %v452_v4 = vsub.f32 %v450_v2, %v451_v3 }
 0x148   : > { %v453_v5 = vmax.f32 %v452_v4, 0.0 }
 0x14a   : > { %v454_v6 = vadd.f32 1e-05, %v453_v5 }
 0x14c   : > { %820 = vrsqrt.f32 %v454_v6 }
 0x159   : > { %v821_v8 = vpop.eup %820 }
 0x15a   : > { %v457_v9 = vmul.f32 %v821_v8, %v456_v7 }
 0x15c   : > { %458 = vst [vmem:[#allocation3] sm:$0x1] %v457_v9  ;;  %v460_v11 = vmul.f32 %v457_v9, %v448_v1 }
 0x15e   : > { %v461_v12 = vsub.f32 %v459_v10, %v460_v11 }
 0x160   : > { %462 = vst [vmem:[#allocation3 + $0x1] sm:$0x1] %v461_v12 }
 0x161 PF: > { %p654_p13 = scmp.ne.s32.totalorder %s848_s13, 1 }
 0x163   : > { %466 = sbr.rel (%p654_p13) target bundleno = 386 (0x182), region = 48 }
 0x168   : > { %v1089_v13 = vld [vmem:[#allocation3] ss:$0 sm:$0xff]  ;;  %v1091_v14 = vld [vmem:[#allocation3 + $0x1] ss:$0 sm:$0xff] }
 0x169   : > { %v472_v15 = vmul.f32 %v1089_v13, %v1002_v35  ;;  %v473_v16 = vmul.f32 %v998_v33, %v1089_v13  ;;  %v474_v17 = vmul.f32 %v1089_v13, %v1010_v39  ;;  %v475_v18 = vmul.f32 %v1006_v37, %v1089_v13 }
 0x16a   : > { %v476_v19 = vmul.f32 %v1089_v13, %v1018_v43  ;;  %v477_v20 = vmul.f32 %v1014_v41, %v1089_v13  ;;  %v478_v21 = vmul.f32 %v1089_v13, %v1026_v47  ;;  %v479_v35 = vmul.f32 %v1022_v45, %v1089_v13 }
 0x16b   : > { %v493_v33 = vadd.f32 %v1091_v14, %v472_v15  ;;  %v494_v22 = vadd.f32 %v1091_v14, %v473_v16  ;;  %v495_v39 = vadd.f32 %v1091_v14, %v474_v17  ;;  %v496_v37 = vadd.f32 %v1091_v14, %v475_v18 }
 0x16c   : > { %v497_v23 = vadd.f32 %v1091_v14, %v476_v19  ;;  %v498_v43 = vadd.f32 %v1091_v14, %v477_v20  ;;  %v499_v41 = vadd.f32 %v1091_v14, %v478_v21  ;;  %v500_v47 = vadd.f32 %v1091_v14, %v479_v35 }
 0x16d   : > { %vm509_vm0 = vcmp.ge.f32.partialorder %v493_v33, 0.0  ;;  %v525_v45 = vmul.f32 0.1, %v493_v33  ;;  %vm510_vm1 = vcmp.ge.f32.partialorder %v494_v22, 0.0  ;;  %v526_v24 = vmul.f32 0.1, %v494_v22 }
 0x16e   : > { %vm511_vm2 = vcmp.ge.f32.partialorder %v495_v39, 0.0  ;;  %v527_v25 = vmul.f32 0.1, %v495_v39  ;;  %vm512_vm3 = vcmp.ge.f32.partialorder %v496_v37, 0.0  ;;  %v528_v26 = vmul.f32 0.1, %v496_v37 }
 0x16f   : > { %v541_v27 = vsel %vm509_vm0, %v493_v33, %v525_v45  ;;  %v542_v28 = vsel %vm510_vm1, %v494_v22, %v526_v24  ;;  %vm513_vm4 = vcmp.ge.f32.partialorder %v497_v23, 0.0  ;;  %v529_v29 = vmul.f32 0.1, %v497_v23 }
 0x170   : > { %557 = vst [vmem:[%s932_s29] sm:$0xff] %v541_v27  ;;  %558 = vst [vmem:[%s932_s29 + $0x8] sm:$0xff] %v542_v28  ;;  %v543_v30 = vsel %vm511_vm2, %v495_v39, %v527_v25  ;;  %v544_v31 = vsel %vm512_vm3, %v496_v37, %v528_v26  ;;  %vm514_vm5 = vcmp.ge.f32.partialorder %v498_v43, 0.0  ;;  %v530_v32 = vmul.f32 0.1, %v498_v43 }
 0x171   : > { %559 = vst [vmem:[%s932_s29 + $0x10] sm:$0xff] %v543_v30  ;;  %560 = vst [vmem:[%s932_s29 + $0x18] sm:$0xff] %v544_v31  ;;  %v545_v49 = vsel %vm513_vm4, %v497_v23, %v529_v29  ;;  %vm515_vm6 = vcmp.ge.f32.partialorder %v499_v41, 0.0  ;;  %v531_v50 = vmul.f32 0.1, %v499_v41  ;;  %vm516_vm7 = vcmp.ge.f32.partialorder %v500_v47, 0.0 }
 0x172   : > { %561 = vst [vmem:[%s932_s29 + $0x20] sm:$0xff] %v545_v49  ;;  %v546_v51 = vsel %vm514_vm5, %v498_v43, %v530_v32  ;;  %v532_v52 = vmul.f32 0.1, %v500_v47  ;;  %v480_v53 = vmul.f32 %v1089_v13, %v1004_v36  ;;  %v481_v54 = vmul.f32 %v1000_v34, %v1089_v13 }
 0x173   : > { %562 = vst [vmem:[%s932_s29 + $0x28] sm:$0xff] %v546_v51  ;;  %v547_v55 = vsel %vm515_vm6, %v499_v41, %v531_v50  ;;  %v482_v56 = vmul.f32 %v1089_v13, %v1012_v40  ;;  %v483_v57 = vmul.f32 %v1008_v38, %v1089_v13  ;;  %v484_v58 = vmul.f32 %v1089_v13, %v1020_v44 }
 0x174   : > { %563 = vst [vmem:[%s932_s29 + $0x30] sm:$0xff] %v547_v55  ;;  %v548_v59 = vsel %vm516_vm7, %v500_v47, %v532_v52  ;;  %v501_v60 = vadd.f32 %v1091_v14, %v480_v53  ;;  %v502_v36 = vadd.f32 %v1091_v14, %v481_v54  ;;  %v485_v34 = vmul.f32 %v1016_v42, %v1089_v13 }
 0x175   : > { %564 = vst [vmem:[%s932_s29 + $0x38] sm:$0xff] %v548_v59  ;;  %v503_v61 = vadd.f32 %v1091_v14, %v482_v56  ;;  %v504_v40 = vadd.f32 %v1091_v14, %v483_v57  ;;  %v505_v38 = vadd.f32 %v1091_v14, %v484_v58  ;;  %v486_v44 = vmul.f32 %v1089_v13, %v1028_v48 }
 0x176   : > { %vm517_vm8 = vcmp.ge.f32.partialorder %v501_v60, 0.0  ;;  %v533_v62 = vmul.f32 0.1, %v501_v60  ;;  %vm518_vm9 = vcmp.ge.f32.partialorder %v502_v36, 0.0  ;;  %v534_v63 = vmul.f32 0.1, %v502_v36 }
 0x177   : > { %vm519_vm10 = vcmp.ge.f32.partialorder %v503_v61, 0.0  ;;  %v535_v42 = vmul.f32 0.1, %v503_v61  ;;  %vm520_vm11 = vcmp.ge.f32.partialorder %v504_v40, 0.0  ;;  %v536_v0 = vmul.f32 0.1, %v504_v40 }
 0x178   : > { %v549_v1 = vsel %vm517_vm8, %v501_v60, %v533_v62  ;;  %v550_v2 = vsel %vm518_vm9, %v502_v36, %v534_v63  ;;  %vm521_vm12 = vcmp.ge.f32.partialorder %v505_v38, 0.0  ;;  %v537_v3 = vmul.f32 0.1, %v505_v38 }
 0x179   : > { %565 = vst [vmem:[%s932_s29 + $0x40] sm:$0xff] %v549_v1  ;;  %566 = vst [vmem:[%s932_s29 + $0x48] sm:$0xff] %v550_v2  ;;  %v551_v4 = vsel %vm519_vm10, %v503_v61, %v535_v42  ;;  %v552_v48 = vsel %vm520_vm11, %v504_v40, %v536_v0  ;;  %v506_v5 = vadd.f32 %v1091_v14, %v485_v34 }
 0x17a   : > { %v507_v6 = vadd.f32 %v1091_v14, %v486_v44  ;;  %567 = vst [vmem:[%s932_s29 + $0x50] sm:$0xff] %v551_v4  ;;  %568 = vst [vmem:[%s932_s29 + $0x58] sm:$0xff] %v552_v48  ;;  %v553_v7 = vsel %vm521_vm12, %v505_v38, %v537_v3  ;;  %v487_v8 = vmul.f32 %v1024_v46, %v1089_v13 }
 0x17b   : > { %569 = vst [vmem:[%s932_s29 + $0x60] sm:$0xff] %v553_v7  ;;  %vm522_vm13 = vcmp.ge.f32.partialorder %v506_v5, 0.0  ;;  %v538_v9 = vmul.f32 0.1, %v506_v5 }
 0x17c   : > { %vm523_vm14 = vcmp.ge.f32.partialorder %v507_v6, 0.0  ;;  %v539_v10 = vmul.f32 0.1, %v507_v6  ;;  %v508_v11 = vadd.f32 %v1091_v14, %v487_v8 }
 0x17d   : > { %v554_v12 = vsel %vm522_vm13, %v506_v5, %v538_v9 }
 0x17e   : > { %v555_v15 = vsel %vm523_vm14, %v507_v6, %v539_v10  ;;  %570 = vst [vmem:[%s932_s29 + $0x68] sm:$0xff] %v554_v12  ;;  %vm524_vm15 = vcmp.ge.f32.partialorder %v508_v11, 0.0  ;;  %v540_v16 = vmul.f32 0.1, %v508_v11 }
 0x17f   : > { %571 = vst [vmem:[%s932_s29 + $0x70] sm:$0xff] %v555_v15 }
 0x180   : > { %v556_v17 = vsel %vm524_vm15, %v508_v11, %v540_v16 }
 0x181   : > { %572 = vst [vmem:[%s932_s29 + $0x78] sm:$0xff] %v556_v17 }
 0x182 PF: > { %s13_s16 = sadd.s32 1, %s860_s16   ;;  %s1176_s12 = smov %s852_s14 }
 0x183   : > { %p10_p0 = scmp.ge.s32.totalorder %s13_s16, 10   ;;  %s1177_s13 = smov %s856_s15 }
 0x184   : > { %s1178_s14 = smov %s1181_s17  ;;  %s1179_s15 = smov %s1185_s18 }
 0x185   :  { %12 = sbr.rel (!%p10_p0) target bundleno = 3 (0x3), region = 78 }

</bundles_post_ra>
